<compile_context>
chip_gen: v6e
topology: v6e:2x2x1
jax: 0.10.0
libtpu: 0.0.40
codegen_flags: <defaults>
</compile_context>

<pallas_src>
import jax
import jax.numpy as jnp
from jax.experimental import pallas as pl
from jax.experimental.pallas import tpu as pltpu


def _round_up(x: int, m: int) -> int:
    return ((x + m - 1) // m) * m


def _pick_vocab_tile(V: int, max_tv: int):
    """Pick a lane-aligned vocab tile TV and padded vocab size Vp.

    Prefers a TV that exactly divides round_up(V, 128) (so Vp - V < 128 and
    the post-kernel slice is ~free); falls back to max_tv with extra padding
    only if the exact-divisor tile would be much smaller than max_tv.
    """
    vp128 = _round_up(V, 128)
    n_lanes = vp128 // 128
    best = 128
    for d in range(1, n_lanes + 1):
        if n_lanes % d == 0 and d * 128 <= max_tv:
            best = d * 128
    if best * 2 > max_tv:
        return best, vp128                      # near-zero padding, big tile
    tv = min(max_tv, vp128)                     # accept some padding instead
    return tv, _round_up(vp128, tv)


def w2v_matmul_kernel(x_ref, w_ref, b_ref, out_ref):
    # x_ref  : (TM, Dp)  bf16  gathered embedding rows (token tile)
    # w_ref  : (Dp, TV)  bf16  transposed linear-weight tile (stationary)
    # b_ref  : (1,  TV)  f32   bias tile
    # out_ref: (TM, TV)  f32 (or bf16 if out_dtype=bf16)
    acc = jnp.dot(x_ref[...], w_ref[...], preferred_element_type=jnp.float32)
    out_ref[...] = (acc + b_ref[...]).astype(out_ref.dtype)


def prepare_word2vec_params(emb_table, w, bias, *, tv=4096):
    """One-time preprocessing of Word2Vec parameters (hoisted out of forward).

    emb_table : (V, D) f32   nn.Embedding.weight
    w         : (V, D) f32   nn.Linear.weight (torch layout)
    bias      : (V,)   f32   nn.Linear.bias
    """
    V, D = emb_table.shape
    TV, Vp = _pick_vocab_tile(V, tv)
    Dp = _round_up(D, 128)

    emb_bf16 = emb_table.astype(jnp.bfloat16)                         # (V, D)
    w_t = jnp.pad(w.T.astype(jnp.bfloat16), ((0, Dp - D), (0, Vp - V)))
    b2 = jnp.pad(bias.astype(jnp.float32).reshape(1, V), ((0, 0), (0, Vp - V)))

    return {
        "emb_bf16": emb_bf16, "w_t": w_t, "bias2d": b2,
        "V": V, "D": D, "Vp": Vp, "Dp": Dp, "TV": TV,
    }


def word2vec_forward(indices, params, *, tm=512, out_dtype=jnp.float32):
    """Forward pass: logits = Linear(Embedding(indices)).

    indices : (B, S) int32 token ids
    params  : dict from prepare_word2vec_params()
    returns : (B, S, V) out_dtype (f32 by default; bf16 halves logit traffic)
    """
    B, S = indices.shape
    N = B * S
    V, D = params["V"], params["D"]
    Vp, Dp, TV = params["Vp"], params["Dp"], params["TV"]

    # Token tile: multiple of 16 (bf16 sublane packing), capped at tm.
    TM = min(_round_up(tm, 16), _round_up(N, 16))
    Np = _round_up(N, TM)

    flat_idx = indices.reshape(N).astype(jnp.int32)

    # Gather from the pre-cast bf16 table (halves gather read bytes), then
    # zero-pad to tile boundaries (zero padding leaves the matmul unchanged).
    # TODO(synk): for very large N*D, switch to an in-kernel double-buffered
    # DMA row-gather to avoid materializing the (N, D) activation tensor.
    x = jnp.take(params["emb_bf16"], flat_idx, axis=0)
    x = jnp.pad(x, ((0, Np - N), (0, Dp - D)))

    grid = (Vp // TV, Np // TM)   # vocab OUTER, token INNER: weight stationary

    out_bytes = jnp.dtype(out_dtype).itemsize
    flops = 2 * Np * Dp * Vp
    bytes_accessed = (
        Np * Dp * 2 * (Vp // TV)   # activation re-streamed once per vocab tile
        + Dp * Vp * 2              # weight streamed exactly once
        + Vp * 4                   # bias
        + Np * Vp * out_bytes      # logits writeback
    )

    out = pl.pallas_call(
        w2v_matmul_kernel,
        out_shape=jax.ShapeDtypeStruct((Np, Vp), out_dtype),
        grid_spec=pltpu.PrefetchScalarGridSpec(
            num_scalar_prefetch=0,
            grid=grid,
            in_specs=[
                # activation tile: varies along the fast (token) axis
                # TODO(synk): consider pipeline_mode=pl.Buffered(3) here if the
                # per-step activation DMA is exposed (verify v7x VMEM budget).
                pl.BlockSpec((TM, Dp), lambda j, i: (i, 0)),
                # weight tile: constant across the inner axis -> DMA'd once
                pl.BlockSpec((Dp, TV), lambda j, i: (0, j)),
                # bias tile: constant across the inner axis
                pl.BlockSpec((1, TV), lambda j, i: (0, j)),
            ],
            out_specs=pl.BlockSpec((TM, TV), lambda j, i: (i, j)),
        ),
        compiler_params=pltpu.CompilerParams(
            dimension_semantics=("parallel", "parallel"),
            vmem_limit_bytes=48 * 1024 * 1024,
        ),
        cost_estimate=pl.CostEstimate(
            flops=flops, transcendentals=0, bytes_accessed=bytes_accessed
        ),
    )(x, params["w_t"], params["bias2d"])

    if Np != N or Vp != V:
        out = out[:N, :V]
    return out.reshape(B, S, V)


if __name__ == "__main__":
    # Small deterministic setup matching nn.Embedding(V, D) / nn.Linear(D, V).
    vocab_size = 64     # V
    embedding_dim = 32  # D
    batch, seq = 2, 8

    key = jax.random.PRNGKey(0)
    k_emb, k_w, k_b, k_idx = jax.random.split(key, 4)

    emb_table = jax.random.normal(k_emb, (vocab_size, embedding_dim), jnp.float32)
    # torch nn.Linear(embedding_dim, vocab_size).weight has shape (V, D).
    w = jax.random.normal(k_w, (vocab_size, embedding_dim), jnp.float32) * 0.1
    bias = jax.random.normal(k_b, (vocab_size,), jnp.float32) * 0.1

    indices = jax.random.randint(k_idx, (batch, seq), 0, vocab_size, jnp.int32)

    # One-time parameter preprocessing (cached; not part of the hot path).
    params = prepare_word2vec_params(emb_table, w, bias)

    out = word2vec_forward(indices, params)
    out = jax.block_until_ready(out)
    assert out.shape == (batch, seq, vocab_size)
    assert out.dtype == jnp.float32

    # Reference 1: same bf16 inputs with f32 accumulation (tight check).
    x_bf16 = jnp.take(emb_table.astype(jnp.bfloat16), indices.reshape(-1), axis=0)
    ref_bf16 = (
        jnp.dot(x_bf16, w.T.astype(jnp.bfloat16), preferred_element_type=jnp.float32)
        .reshape(batch, seq, vocab_size)
        + bias
    )
    assert jnp.allclose(out, ref_bf16, atol=1e-3, rtol=1e-3), "mismatch vs bf16 reference"

    # Reference 2: pure f32 torch-style forward (loose check, bf16 rounding).
    ref_f32 = jnp.take(emb_table, indices, axis=0) @ w.T + bias
    assert jnp.allclose(out, ref_f32, atol=5e-2, rtol=5e-2), "mismatch vs f32 reference"

    print("KERNEL_OK")
</pallas_src>

<mosaic_0001>
module attributes {stable_mosaic.version = 11 : i64} {
  func.func @w2v_matmul_kernel(%arg0: i32, %arg1: i32, %arg2: memref<16x128xbf16, #tpu.memory_space<vmem>>, %arg3: memref<128x128xbf16, #tpu.memory_space<vmem>>, %arg4: memref<1x128xf32, #tpu.memory_space<vmem>>, %arg5: memref<16x128xf32, #tpu.memory_space<vmem>>) attributes {dimension_semantics = [#tpu.dimension_semantics<parallel>, #tpu.dimension_semantics<parallel>], iteration_bounds = array<i64: 1, 1>, scalar_prefetch = 0 : i64, scratch_operands = 0 : i64, tpu.core_type = #tpu.core_type<tc>, window_params = [{transform_indices = @transform_0, window_bounds = array<i64: 16, 128>}, {transform_indices = @transform_1, window_bounds = array<i64: 128, 128>}, {transform_indices = @transform_2, window_bounds = array<i64: 1, 128>}, {transform_indices = @transform_3, window_bounds = array<i64: 16, 128>}]} {
    %c0 = arith.constant 0 : index
    %c0_0 = arith.constant 0 : index
    %0 = vector.load %arg2[%c0, %c0_0] : memref<16x128xbf16, #tpu.memory_space<vmem>>, vector<16x128xbf16>
    %c0_1 = arith.constant 0 : index
    %c0_2 = arith.constant 0 : index
    %1 = vector.load %arg3[%c0_1, %c0_2] : memref<128x128xbf16, #tpu.memory_space<vmem>>, vector<128x128xbf16>
    %cst = arith.constant dense<0.000000e+00> : vector<16x128xf32>
    %2 = tpu.matmul %0, %1, %cst {dimension_numbers = #tpu.dot_dimension_numbers<[1], [0], [0], [1], [0, 0, 1, 1], [], []>} : vector<16x128xbf16>, vector<128x128xbf16>, vector<16x128xf32> -> vector<16x128xf32>
    %c0_3 = arith.constant 0 : index
    %c0_4 = arith.constant 0 : index
    %3 = vector.load %arg4[%c0_3, %c0_4] : memref<1x128xf32, #tpu.memory_space<vmem>>, vector<1x128xf32>
    %4 = vector.broadcast %3 : vector<1x128xf32> to vector<16x128xf32>
    %5 = arith.addf %2, %4 : vector<16x128xf32>
    %c0_5 = arith.constant 0 : index
    %c0_6 = arith.constant 0 : index
    %6 = vector.load %arg5[%c0_5, %c0_6] : memref<16x128xf32, #tpu.memory_space<vmem>>, vector<16x128xf32>
    tpu.vector_store %arg5[%c0_5, %c0_6], %5 {strides = array<i32>} : memref<16x128xf32, #tpu.memory_space<vmem>>, vector<16x128xf32>,
    return
  }
  func.func @transform_0(%arg0: i32, %arg1: i32) -> (i32, i32) {
    %c0_i32 = arith.constant 0 : i32
    %c0_i32_0 = arith.constant 0 : i32
    return %arg1, %c0_i32 : i32, i32
  }
  func.func @transform_1(%arg0: i32, %arg1: i32) -> (i32, i32) {
    %c0_i32 = arith.constant 0 : i32
    %c0_i32_0 = arith.constant 0 : i32
    return %c0_i32, %arg0 : i32, i32
  }
  func.func @transform_2(%arg0: i32, %arg1: i32) -> (i32, i32) {
    %c0_i32 = arith.constant 0 : i32
    %c0_i32_0 = arith.constant 0 : i32
    return %c0_i32, %arg0 : i32, i32
  }
  func.func @transform_3(%arg0: i32, %arg1: i32) -> (i32, i32) {
    %c0_i32 = arith.constant 0 : i32
    return %arg1, %arg0 : i32, i32
  }
}

</mosaic_0001>

<bundles_post_ra>
// kernel: tpu_custom_call.1
= control target key start
LH: loop header
LB: loop body
LE: loop exit
PB: predicated region body
PF: predicated region fallthrough
CT: control target
= control target key end

     0   :  { %8 = vsyncpa [#allocation3], 0  ;;  %s348_s0 = inlined_call_operand.hbm [shape: bf16[16,128], index: 0, kind: input, shape index: {}]   ;;  %s349_s1 = inlined_call_operand.hbm [shape: bf16[128,128], index: 1, kind: input, shape index: {}]   ;;  %s350_s2 = inlined_call_operand.vmem [shape: f32[1,128], index: 2, kind: input, shape index: {}]   ;;  %s351_s3 = inlined_call_operand.hbm [shape: f32[16,128], index: 3, kind: output, shape index: {}]  }
   0x1   :  { %9 = vsyncpa [#allocation6], 0 }
   0x2   :  { %10 = vsyncpa [#allocation4], 0  ;;  %s307_s12 = smov [#allocation2]  }
   0x3   :  { %s16_s13 = sshll.u32 %s307_s12, 4  ;;  %s17_s13 = int_to_ptr.vmem [resolvable:$true] %s16_s13 }
   0x4   :  { %s249_s14 = scalar_lea.vmem %s17_s13, 128  ;;  %p254_p1 = scmp.lt.s32.totalorder %s17_s13, %s17_s13 }
   0x5   :  { %p250_p0 = scmp.ne.s32.totalorder %s17_s13, %s249_s14  ;;  %p255_p2 = scmp.lt.s32.totalorder %s249_s14, %s249_s14 }
   0x7   :  { %p256_p3 = por %p255_p2, %p254_p1 }
   0x9   :  { %p257_p4 = pnand %p256_p3, %p250_p0 }
   0xb   :  { %260 = shalt.err (!%p257_p4)
}
   0xc   :  { %s308_s15 = smov 64   ;;  %s309_s16 = smov 4  }
   0xd   :  { %22 = dma.hbm_to_vmem [thread:$0]  %s348_s0, 128, %s17_s13, [#allocation3], %s308_s15, %s308_s15, %s309_s16  }
   0xe   :  { %s310_s19 = smov [#allocation5]  }
   0xf   :  { %s28_s20 = sshll.u32 %s310_s19, 4  ;;  %s29_s20 = int_to_ptr.vmem [resolvable:$true] %s28_s20 }
  0x10   :  { %s269_s21 = scalar_lea.vmem %s29_s20, 1024  ;;  %p274_p6 = scmp.lt.s32.totalorder %s29_s20, %s29_s20 }
  0x11   :  { %p270_p5 = scmp.ne.s32.totalorder %s29_s20, %s269_s21  ;;  %p275_p7 = scmp.lt.s32.totalorder %s269_s21, %s269_s21 }
  0x13   :  { %p276_p8 = por %p275_p7, %p274_p6 }
  0x15   :  { %p277_p9 = pnand %p276_p8, %p270_p5 }
  0x17   :  { %280 = shalt.err (!%p277_p9)
}
  0x18   :  { %34 = dma.hbm_to_vmem [thread:$0]  %s349_s1, 1024, %s29_s20, [#allocation6], %s308_s15, %s308_s15, %s309_s16  }
  0x19   :  { %301 = dma.done.wait [#allocation3], 128  }
  0x1a   :  { %302 = vsyncadd [#allocation3], 4294967168 }
  0x1b   :  { %303 = dma.done.wait [#allocation6], 1024  }
  0x1c   :  { %304 = vsyncadd [#allocation6], 4294966272  ;;  %v311_v0 = vmov 0.0   ;;  %vm312_vm0 = vmmov 0   ;;  %v232_v1 = vld [vmem:[#allocation5 + $0x38] sm:$0xff]   ;;  %v233_v2 = vld [vmem:[#allocation5 + $0x30] sm:$0xff]  }
  0x1d   :  { %203 = vmatprep.subr.bf16.mxu0 %v311_v0  ;;  %219 = vmatprep.mubr.msk.bf16.mxu0 %vm312_vm0, %v311_v0  ;;  %v234_v3 = vld [vmem:[#allocation5 + $0x28] sm:$0xff]   ;;  %v235_v4 = vld [vmem:[#allocation5 + $0x20] sm:$0xff]   ;;  %v236_v5 = vld [vmem:[#allocation5 + $0x18] sm:$0xff]   ;;  %s313_s24 = smov [#allocation7]  }
  0x1e   :  { %204 = vmatpush3.bf16.msra.mxu0 %v232_v1  ;;  %v237_v6 = vld [vmem:[#allocation5 + $0x10] sm:$0xff]   ;;  %v238_v7 = vld [vmem:[#allocation5 + $0x8] sm:$0xff]   ;;  %v239_v8 = vld [vmem:[#allocation5] sm:$0xff]   ;;  %s171_s25 = sshll.u32 %s313_s24, 4  ;;  %s172_s25 = int_to_ptr.vmem [resolvable:$true] %s171_s25 }
  0x1f   :  { %205 = vmatprep.subr.bf16.mxu0 %v311_v0  ;;  %v240_v9 = vld [vmem:[#allocation2] sm:$0xff]   ;;  %s281_s26 = scalar_lea.vmem %s172_s25, 256  ;;  %p286_p11 = scmp.lt.s32.totalorder %s172_s25, %s172_s25 }
  0x20   :  { %v184_v10 = vld [vmem:[%s350_s2] ss:$0 sm:$0xff]  ;;  %p282_p10 = scmp.ne.s32.totalorder %s172_s25, %s281_s26  ;;  %p287_p12 = scmp.lt.s32.totalorder %s281_s26, %s281_s26 }
  0x22   :  { %206 = vmatpush3.bf16.msra.mxu0 %v233_v2  ;;  %p288_p13 = por %p287_p12, %p286_p11 }
  0x23   :  { %207 = vmatprep.subr.bf16.mxu0 %v311_v0 }
  0x24   :  { %p289_p0 = pnand %p288_p13, %p282_p10 }
  0x26   :  { %208 = vmatpush3.bf16.msra.mxu0 %v234_v3 }
  0x27   :  { %209 = vmatprep.subr.bf16.mxu0 %v311_v0 }
  0x2a   :  { %210 = vmatpush3.bf16.msra.mxu0 %v235_v4 }
  0x2b   :  { %211 = vmatprep.subr.bf16.mxu0 %v311_v0 }
  0x2e   :  { %212 = vmatpush3.bf16.msra.mxu0 %v236_v5 }
  0x2f   :  { %213 = vmatprep.subr.bf16.mxu0 %v311_v0 }
  0x32   :  { %214 = vmatpush3.bf16.msra.mxu0 %v237_v6 }
  0x33   :  { %215 = vmatprep.subr.bf16.mxu0 %v311_v0 }
  0x36   :  { %216 = vmatpush3.bf16.msra.mxu0 %v238_v7 }
  0x37   :  { %217 = vmatprep.subr.bf16.mxu0 %v311_v0 }
  0x3a   :  { %218 = vmatpush3.bf16.msra.mxu0 %v239_v8 }
  0x3d   :  { %220 = vmatmul.mubr.bf16.vlgmr.msra.gmra.mxu0 %v240_v9 }
  0xfd   :  { %v157_v11 = vpop.f32.mrf.mxu0 }
  0xfe   :  { %v158_v12 = vadd.f32 %v184_v10, %v157_v11 }
  0xff   :  { %v221_v13 = vpop.f32.mrf.mxu0 }
 0x100   :  { %164 = vst [vmem:[#allocation7] sm:$0xff] %v158_v12 }
 0x101   :  { %v160_v14 = vpop.f32.mrf.mxu0 }
 0x102   :  { %v161_v15 = vadd.f32 %v184_v10, %v160_v14 }
 0x103   :  { %v222_v16 = vpop.f32.mrf.mxu0 }
 0x104   :  { %165 = vst [vmem:[#allocation7 + $0x8] sm:$0xff] %v161_v15 }
 0x105   :  { %292 = shalt.err (!%p289_p0)
}
 0x106   :  { %s314_s27 = smov 128   ;;  %s315_s2 = smov 8  }
 0x107   :  { %177 = dma.vmem_to_hbm [thread:$0]  %s172_s25, 256, %s351_s3, [#allocation4], %s314_s27, %s314_s27, %s315_s2  }
 0x108   :  { %305 = dma.done.wait [#allocation4], 256  }
 0x109   :  { %306 = vsyncadd [#allocation4], 4294967040 }
 0x10a   :  { %181 = vsyncpa [#allocation3], 1 }
 0x10b   :  { %182 = vsyncpa [#allocation6], 1 }
 0x10c   :  { %183 = vsyncpa [#allocation4], 1 }

</bundles_post_ra>
